<compile_context>
chip_gen: v6e
topology: v6e:2x2x1
jax: 0.10.0
libtpu: 0.0.40
codegen_flags: <defaults>
</compile_context>

<pallas_src>
import functools

import jax
import jax.numpy as jnp
from jax.experimental import pallas as pl
from jax.experimental.pallas import tpu as pltpu


ENCODING_DIM = 32
HIDDEN_DIM = 64
NEG_SLOPE = 0.1
PACK = 8  # rows packed side-by-side along the lane axis (== sublane count)


def _leaky_relu(v):
    return jnp.where(v >= 0, v, NEG_SLOPE * v)


def _round_up(n, m):
    return ((n + m - 1) // m) * m


def autoencoder_kernel(x_ref,
                       w1_ref, b1_ref,   # (packed) D   -> 64
                       w2_ref, b2_ref,   # (packed) 64  -> 32
                       w3_ref, b3_ref,   # (packed) 32  -> 64
                       w4_ref, b4_ref,   # (packed) 64  -> D
                       enc_ref, dec_ref):
    x = x_ref[...]                                               # [TR, 8*Dp] bf16

    # ---- encoder ----  (nn.Dropout(0.3) is identity in eval mode)
    h1 = jnp.dot(x, w1_ref[...], preferred_element_type=jnp.float32) + b1_ref[...]
    h1 = _leaky_relu(h1)                                         # [TR, 8*64] f32
    enc = jnp.dot(h1.astype(jnp.bfloat16), w2_ref[...],
                  preferred_element_type=jnp.float32) + b2_ref[...]
    enc = _leaky_relu(enc)                                       # [TR, 8*32] f32
    enc_ref[...] = enc                                           # lane-dense store

    # ---- decoder ----
    h3 = jnp.dot(enc.astype(jnp.bfloat16), w3_ref[...],
                 preferred_element_type=jnp.float32) + b3_ref[...]
    h3 = _leaky_relu(h3)                                         # [TR, 8*64] f32
    dec_ref[...] = (jnp.dot(h3.astype(jnp.bfloat16), w4_ref[...],
                            preferred_element_type=jnp.float32)
                    + b4_ref[...])                               # [TR, 8*Dp]


def autoencoder_forward(x, params, *, block_rows=128):
    """x: [B, D] f32. params: pre-transposed [in,out] weights, [1,out] biases.

    Returns (encoded [B, enc_dim] f32, decoded [B, D] f32)."""
    B, D = x.shape
    hid = params["w1"].shape[1]
    enc_dim = params["w2"].shape[1]
    P = PACK

    # --- feature padding so PACK * D_pad is a multiple of 128 (lane-dense) ---
    D_pad = _round_up(D, 128 // P)
    w1 = jnp.pad(params["w1"], ((0, D_pad - D), (0, 0)))
    w4 = jnp.pad(params["w4"], ((0, 0), (0, D_pad - D)))
    b4 = jnp.pad(params["b4"], ((0, 0), (0, D_pad - D)))
    layer_params = [(w1, params["b1"]), (params["w2"], params["b2"]),
                    (params["w3"], params["b3"]), (w4, b4)]

    # --- batch packing: 8 rows per packed row -> lane-dense activations ---
    Rp = pl.cdiv(B, P)                       # packed rows before tiling
    TR = min(int(block_rows), Rp)            # packed rows per grid step
    if TR < Rp:
        TR = max(8, (TR // 8) * 8)           # keep sublane-aligned blocks
        Rp = _round_up(Rp, TR)
    B_pad = Rp * P
    x_pad = jnp.pad(x, ((0, B_pad - B), (0, D_pad - D)))
    x_packed = x_pad.reshape(Rp, P * D_pad).astype(jnp.bfloat16)

    # Block-diagonal weights / tiled biases so the packed layout is preserved
    # end-to-end (kron(I_P, W) has W on the diagonal blocks).
    eye = jnp.eye(P, dtype=jnp.float32)
    packed = []
    for w, b in layer_params:
        packed.append(jnp.kron(eye, w).astype(jnp.bfloat16))
        packed.append(jnp.tile(b, (1, P)).astype(jnp.float32))
    pw1, pb1, pw2, pb2, pw3, pb3, pw4, pb4 = packed

    n_tiles = Rp // TR
    row_spec = lambda cols: pl.BlockSpec((TR, cols), lambda i: (i, 0))
    # Constant index_map -> weights/biases stay resident in VMEM across steps.
    full_spec = lambda arr: pl.BlockSpec(arr.shape, lambda i: (0, 0))

    flops = 2 * B_pad * P * (D_pad * hid + hid * enc_dim + enc_dim * hid
                             + hid * D_pad)
    bytes_accessed = (int(x_packed.size) * 2
                      + sum(int(a.size) * a.dtype.itemsize for a in packed)
                      + B_pad * (enc_dim + D_pad) * 4)

    encoded_p, decoded_p = pl.pallas_call(
        autoencoder_kernel,
        grid=(n_tiles,),
        in_specs=[
            row_spec(P * D_pad),
            full_spec(pw1), full_spec(pb1),
            full_spec(pw2), full_spec(pb2),
            full_spec(pw3), full_spec(pb3),
            full_spec(pw4), full_spec(pb4),
        ],
        out_specs=(row_spec(P * enc_dim), row_spec(P * D_pad)),
        out_shape=(
            jax.ShapeDtypeStruct((Rp, P * enc_dim), jnp.float32),
            jax.ShapeDtypeStruct((Rp, P * D_pad), jnp.float32),
        ),
        compiler_params=pltpu.CompilerParams(
            dimension_semantics=("parallel",)),
        cost_estimate=pl.CostEstimate(flops=int(flops), transcendentals=0,
                                      bytes_accessed=int(bytes_accessed)),
    )(x_packed, pw1, pb1, pw2, pb2, pw3, pb3, pw4, pb4)

    # Row-major un-pack (free at the HBM level) and drop padding rows/cols.
    encoded = encoded_p.reshape(B_pad, enc_dim)[:B]
    decoded = decoded_p.reshape(B_pad, D_pad)[:B, :D]
    return encoded, decoded


def init_params(key, input_dim, encoding_dim=ENCODING_DIM, hidden=HIDDEN_DIM):
    """PyTorch-Linear-style init U(-1/sqrt(fan_in), +1/sqrt(fan_in)).
    Weights stored already transposed as [in, out]; biases as [1, out]."""
    dims = [(input_dim, hidden), (hidden, encoding_dim),
            (encoding_dim, hidden), (hidden, input_dim)]
    params = {}
    keys = jax.random.split(key, 2 * len(dims))
    for i, (fan_in, fan_out) in enumerate(dims):
        bound = 1.0 / (fan_in ** 0.5)
        params[f"w{i + 1}"] = jax.random.uniform(
            keys[2 * i], (fan_in, fan_out), minval=-bound, maxval=bound,
            dtype=jnp.float32)
        params[f"b{i + 1}"] = jax.random.uniform(
            keys[2 * i + 1], (1, fan_out), minval=-bound, maxval=bound,
            dtype=jnp.float32)
    return params


def reference_forward(x, p):
    """Pure-JAX f32 reference of the module's forward pass (eval-mode dropout)."""
    h1 = _leaky_relu(x @ p["w1"] + p["b1"])
    enc = _leaky_relu(h1 @ p["w2"] + p["b2"])
    h3 = _leaky_relu(enc @ p["w3"] + p["b3"])
    dec = h3 @ p["w4"] + p["b4"]
    return enc, dec


if __name__ == "__main__":
    key = jax.random.PRNGKey(0)
    k_x, k_p = jax.random.split(key)

    batch = 128       # small demo; block_rows=8 packed rows -> 2-step batch grid
    input_dim = 16    # stands in for training_tensor.shape[1]

    x = jax.random.normal(k_x, (batch, input_dim), dtype=jnp.float32)
    params = init_params(k_p, input_dim)

    fwd = jax.jit(functools.partial(autoencoder_forward, block_rows=8))
    encoded, decoded = fwd(x, params)
    jax.block_until_ready((encoded, decoded))

    enc_ref, dec_ref = reference_forward(x, params)
    assert encoded.shape == (batch, ENCODING_DIM)
    assert decoded.shape == (batch, input_dim)
    # bf16 MXU inputs vs. f32 reference -> loosened tolerance.
    assert jnp.allclose(encoded, enc_ref, atol=5e-2, rtol=5e-2)
    assert jnp.allclose(decoded, dec_ref, atol=5e-2, rtol=5e-2)

    print("KERNEL_OK")
</pallas_src>

<mosaic_0001>
module attributes {stable_mosaic.version = 11 : i64} {
  func.func @autoencoder_kernel(%arg0: i32, %arg1: memref<8x128xbf16, #tpu.memory_space<vmem>>, %arg2: memref<128x512xbf16, #tpu.memory_space<vmem>>, %arg3: memref<1x512xf32, #tpu.memory_space<vmem>>, %arg4: memref<512x256xbf16, #tpu.memory_space<vmem>>, %arg5: memref<1x256xf32, #tpu.memory_space<vmem>>, %arg6: memref<256x512xbf16, #tpu.memory_space<vmem>>, %arg7: memref<1x512xf32, #tpu.memory_space<vmem>>, %arg8: memref<512x128xbf16, #tpu.memory_space<vmem>>, %arg9: memref<1x128xf32, #tpu.memory_space<vmem>>, %arg10: memref<8x256xf32, #tpu.memory_space<vmem>>, %arg11: memref<8x128xf32, #tpu.memory_space<vmem>>) attributes {dimension_semantics = [#tpu.dimension_semantics<parallel>], iteration_bounds = array<i64: 2>, scalar_prefetch = 0 : i64, scratch_operands = 0 : i64, tpu.core_type = #tpu.core_type<tc>, window_params = [{transform_indices = @transform_0, window_bounds = array<i64: 8, 128>}, {pipeline_mode = #tpu.pipeline_mode<synchronous>, transform_indices = @transform_1, window_bounds = array<i64: 128, 512>}, {pipeline_mode = #tpu.pipeline_mode<synchronous>, transform_indices = @transform_2, window_bounds = array<i64: 1, 512>}, {pipeline_mode = #tpu.pipeline_mode<synchronous>, transform_indices = @transform_3, window_bounds = array<i64: 512, 256>}, {pipeline_mode = #tpu.pipeline_mode<synchronous>, transform_indices = @transform_4, window_bounds = array<i64: 1, 256>}, {pipeline_mode = #tpu.pipeline_mode<synchronous>, transform_indices = @transform_5, window_bounds = array<i64: 256, 512>}, {pipeline_mode = #tpu.pipeline_mode<synchronous>, transform_indices = @transform_6, window_bounds = array<i64: 1, 512>}, {pipeline_mode = #tpu.pipeline_mode<synchronous>, transform_indices = @transform_7, window_bounds = array<i64: 512, 128>}, {pipeline_mode = #tpu.pipeline_mode<synchronous>, transform_indices = @transform_8, window_bounds = array<i64: 1, 128>}, {transform_indices = @transform_9, window_bounds = array<i64: 8, 256>}, {transform_indices = @transform_10, window_bounds = array<i64: 8, 128>}]} {
    %c0 = arith.constant 0 : index
    %c0_0 = arith.constant 0 : index
    %0 = vector.load %arg1[%c0, %c0_0] : memref<8x128xbf16, #tpu.memory_space<vmem>>, vector<8x128xbf16>
    %c0_1 = arith.constant 0 : index
    %c0_2 = arith.constant 0 : index
    %1 = vector.load %arg2[%c0_1, %c0_2] : memref<128x512xbf16, #tpu.memory_space<vmem>>, vector<128x512xbf16>
    %cst = arith.constant dense<0.000000e+00> : vector<8x512xf32>
    %2 = tpu.matmul %0, %1, %cst {dimension_numbers = #tpu.dot_dimension_numbers<[1], [0], [0], [1], [0, 0, 1, 1], [], []>} : vector<8x128xbf16>, vector<128x512xbf16>, vector<8x512xf32> -> vector<8x512xf32>
    %c0_3 = arith.constant 0 : index
    %c0_4 = arith.constant 0 : index
    %3 = vector.load %arg3[%c0_3, %c0_4] : memref<1x512xf32, #tpu.memory_space<vmem>>, vector<1x512xf32>
    %4 = vector.broadcast %3 : vector<1x512xf32> to vector<8x512xf32>
    %5 = arith.addf %2, %4 : vector<8x512xf32>
    %cst_5 = arith.constant 0.000000e+00 : f32
    %6 = vector.broadcast %cst_5 : f32 to vector<8x512xf32>
    %7 = arith.cmpf oge, %5, %6 : vector<8x512xf32>
    %cst_6 = arith.constant 1.000000e-01 : f32
    %8 = vector.broadcast %cst_6 : f32 to vector<8x512xf32>
    %9 = arith.mulf %8, %5 : vector<8x512xf32>
    %10 = arith.select %7, %5, %9 : vector<8x512xi1>, vector<8x512xf32>
    %11 = arith.truncf %10 : vector<8x512xf32> to vector<8x512xbf16>
    %c0_7 = arith.constant 0 : index
    %c0_8 = arith.constant 0 : index
    %12 = vector.load %arg4[%c0_7, %c0_8] : memref<512x256xbf16, #tpu.memory_space<vmem>>, vector<512x256xbf16>
    %cst_9 = arith.constant dense<0.000000e+00> : vector<8x256xf32>
    %13 = tpu.matmul %11, %12, %cst_9 {dimension_numbers = #tpu.dot_dimension_numbers<[1], [0], [0], [1], [0, 0, 1, 1], [], []>} : vector<8x512xbf16>, vector<512x256xbf16>, vector<8x256xf32> -> vector<8x256xf32>
    %c0_10 = arith.constant 0 : index
    %c0_11 = arith.constant 0 : index
    %14 = vector.load %arg5[%c0_10, %c0_11] : memref<1x256xf32, #tpu.memory_space<vmem>>, vector<1x256xf32>
    %15 = vector.broadcast %14 : vector<1x256xf32> to vector<8x256xf32>
    %16 = arith.addf %13, %15 : vector<8x256xf32>
    %cst_12 = arith.constant 0.000000e+00 : f32
    %17 = vector.broadcast %cst_12 : f32 to vector<8x256xf32>
    %18 = arith.cmpf oge, %16, %17 : vector<8x256xf32>
    %cst_13 = arith.constant 1.000000e-01 : f32
    %19 = vector.broadcast %cst_13 : f32 to vector<8x256xf32>
    %20 = arith.mulf %19, %16 : vector<8x256xf32>
    %21 = arith.select %18, %16, %20 : vector<8x256xi1>, vector<8x256xf32>
    %c0_14 = arith.constant 0 : index
    %c0_15 = arith.constant 0 : index
    %22 = vector.load %arg10[%c0_14, %c0_15] : memref<8x256xf32, #tpu.memory_space<vmem>>, vector<8x256xf32>
    tpu.vector_store %arg10[%c0_14, %c0_15], %21 {strides = array<i32>} : memref<8x256xf32, #tpu.memory_space<vmem>>, vector<8x256xf32>,
    %23 = arith.truncf %21 : vector<8x256xf32> to vector<8x256xbf16>
    %c0_16 = arith.constant 0 : index
    %c0_17 = arith.constant 0 : index
    %24 = vector.load %arg6[%c0_16, %c0_17] : memref<256x512xbf16, #tpu.memory_space<vmem>>, vector<256x512xbf16>
    %cst_18 = arith.constant dense<0.000000e+00> : vector<8x512xf32>
    %25 = tpu.matmul %23, %24, %cst_18 {dimension_numbers = #tpu.dot_dimension_numbers<[1], [0], [0], [1], [0, 0, 1, 1], [], []>} : vector<8x256xbf16>, vector<256x512xbf16>, vector<8x512xf32> -> vector<8x512xf32>
    %c0_19 = arith.constant 0 : index
    %c0_20 = arith.constant 0 : index
    %26 = vector.load %arg7[%c0_19, %c0_20] : memref<1x512xf32, #tpu.memory_space<vmem>>, vector<1x512xf32>
    %27 = vector.broadcast %26 : vector<1x512xf32> to vector<8x512xf32>
    %28 = arith.addf %25, %27 : vector<8x512xf32>
    %cst_21 = arith.constant 0.000000e+00 : f32
    %29 = vector.broadcast %cst_21 : f32 to vector<8x512xf32>
    %30 = arith.cmpf oge, %28, %29 : vector<8x512xf32>
    %cst_22 = arith.constant 1.000000e-01 : f32
    %31 = vector.broadcast %cst_22 : f32 to vector<8x512xf32>
    %32 = arith.mulf %31, %28 : vector<8x512xf32>
    %33 = arith.select %30, %28, %32 : vector<8x512xi1>, vector<8x512xf32>
    %34 = arith.truncf %33 : vector<8x512xf32> to vector<8x512xbf16>
    %c0_23 = arith.constant 0 : index
    %c0_24 = arith.constant 0 : index
    %35 = vector.load %arg8[%c0_23, %c0_24] : memref<512x128xbf16, #tpu.memory_space<vmem>>, vector<512x128xbf16>
    %cst_25 = arith.constant dense<0.000000e+00> : vector<8x128xf32>
    %36 = tpu.matmul %34, %35, %cst_25 {dimension_numbers = #tpu.dot_dimension_numbers<[1], [0], [0], [1], [0, 0, 1, 1], [], []>} : vector<8x512xbf16>, vector<512x128xbf16>, vector<8x128xf32> -> vector<8x128xf32>
    %c0_26 = arith.constant 0 : index
    %c0_27 = arith.constant 0 : index
    %37 = vector.load %arg9[%c0_26, %c0_27] : memref<1x128xf32, #tpu.memory_space<vmem>>, vector<1x128xf32>
    %38 = vector.broadcast %37 : vector<1x128xf32> to vector<8x128xf32>
    %39 = arith.addf %36, %38 : vector<8x128xf32>
    %c0_28 = arith.constant 0 : index
    %c0_29 = arith.constant 0 : index
    %40 = vector.load %arg11[%c0_28, %c0_29] : memref<8x128xf32, #tpu.memory_space<vmem>>, vector<8x128xf32>
    tpu.vector_store %arg11[%c0_28, %c0_29], %39 {strides = array<i32>} : memref<8x128xf32, #tpu.memory_space<vmem>>, vector<8x128xf32>,
    return
  }
  func.func @transform_0(%arg0: i32) -> (i32, i32) {
    %c0_i32 = arith.constant 0 : i32
    %c0_i32_0 = arith.constant 0 : i32
    return %arg0, %c0_i32 : i32, i32
  }
  func.func @transform_1(%arg0: i32) -> (i32, i32) {
    %c0_i32 = arith.constant 0 : i32
    %c0_i32_0 = arith.constant 0 : i32
    %c0_i32_1 = arith.constant 0 : i32
    return %c0_i32, %c0_i32_0 : i32, i32
  }
  func.func @transform_2(%arg0: i32) -> (i32, i32) {
    %c0_i32 = arith.constant 0 : i32
    %c0_i32_0 = arith.constant 0 : i32
    %c0_i32_1 = arith.constant 0 : i32
    return %c0_i32, %c0_i32_0 : i32, i32
  }
  func.func @transform_3(%arg0: i32) -> (i32, i32) {
    %c0_i32 = arith.constant 0 : i32
    %c0_i32_0 = arith.constant 0 : i32
    %c0_i32_1 = arith.constant 0 : i32
    return %c0_i32, %c0_i32_0 : i32, i32
  }
  func.func @transform_4(%arg0: i32) -> (i32, i32) {
    %c0_i32 = arith.constant 0 : i32
    %c0_i32_0 = arith.constant 0 : i32
    %c0_i32_1 = arith.constant 0 : i32
    return %c0_i32, %c0_i32_0 : i32, i32
  }
  func.func @transform_5(%arg0: i32) -> (i32, i32) {
    %c0_i32 = arith.constant 0 : i32
    %c0_i32_0 = arith.constant 0 : i32
    %c0_i32_1 = arith.constant 0 : i32
    return %c0_i32, %c0_i32_0 : i32, i32
  }
  func.func @transform_6(%arg0: i32) -> (i32, i32) {
    %c0_i32 = arith.constant 0 : i32
    %c0_i32_0 = arith.constant 0 : i32
    %c0_i32_1 = arith.constant 0 : i32
    return %c0_i32, %c0_i32_0 : i32, i32
  }
  func.func @transform_7(%arg0: i32) -> (i32, i32) {
    %c0_i32 = arith.constant 0 : i32
    %c0_i32_0 = arith.constant 0 : i32
    %c0_i32_1 = arith.constant 0 : i32
    return %c0_i32, %c0_i32_0 : i32, i32
  }
  func.func @transform_8(%arg0: i32) -> (i32, i32) {
    %c0_i32 = arith.constant 0 : i32
    %c0_i32_0 = arith.constant 0 : i32
    %c0_i32_1 = arith.constant 0 : i32
    return %c0_i32, %c0_i32_0 : i32, i32
  }
  func.func @transform_9(%arg0: i32) -> (i32, i32) {
    %c0_i32 = arith.constant 0 : i32
    %c0_i32_0 = arith.constant 0 : i32
    return %arg0, %c0_i32 : i32, i32
  }
  func.func @transform_10(%arg0: i32) -> (i32, i32) {
    %c0_i32 = arith.constant 0 : i32
    %c0_i32_0 = arith.constant 0 : i32
    return %arg0, %c0_i32 : i32, i32
  }
}

</mosaic_0001>

<bundles_post_ra>
// kernel: autoencoder_forward.1
= control target key start
LH: loop header
LB: loop body
LE: loop exit
PB: predicated region body
PF: predicated region fallthrough
CT: control target
= control target key end

     0   :  { %s2698_s13 = smov 0   ;;  %s3339_s0 = inlined_call_operand.vmem [shape: bf16[16,128], index: 0, kind: input, shape index: {}]   ;;  %s3340_s1 = inlined_call_operand.vmem [shape: bf16[128,512], index: 1, kind: input, shape index: {}]   ;;  %s3341_s2 = inlined_call_operand.vmem [shape: f32[1,512], index: 2, kind: input, shape index: {}]   ;;  %s3342_s3 = inlined_call_operand.vmem [shape: bf16[512,256], index: 3, kind: input, shape index: {}]   ;;  %s3343_s4 = inlined_call_operand.vmem [shape: f32[1,256], index: 4, kind: input, shape index: {}]   ;;  %s3344_s5 = inlined_call_operand.vmem [shape: bf16[256,512], index: 5, kind: input, shape index: {}]   ;;  %s3345_s6 = inlined_call_operand.vmem [shape: f32[1,512], index: 6, kind: input, shape index: {}]   ;;  %s3346_s7 = inlined_call_operand.vmem [shape: bf16[512,128], index: 7, kind: input, shape index: {}]   ;;  %s3347_s8 = inlined_call_operand.vmem [shape: f32[1,128], index: 8, kind: input, shape index: {}]   ;;  %s3348_s9 = inlined_call_operand.vmem [shape: f32[16,256], index: 9, kind: output, shape index: {0}]   ;;  %s3349_s10 = inlined_call_operand.vmem [shape: f32[16,128], index: 10, kind: output, shape index: {1}]  }
   0x1 LB: > { %s2104_s14 = sadd.s32 4294967295, %s2640_s13   ;;  %p2108_p0 = scmp.ge.s32.totalorder %s2640_s13, 1  ;;  %s2640_s13 = sphi %s2698_s13, %s21_s13  }
   0x2   : > { %p314_p1 = scmp.lt.s32.totalorder %s2640_s13, 3 }
   0x4   : > { %p315_p2 = pnand %p2108_p0, %p314_p1 }
   0x5   : > { %p355_p3 = scmp.lt.s32.totalorder (!%p315_p2), %s2104_s14, 1 }
   0x6   : > { %318 = sbr.rel (%p315_p2) target bundleno = 858 (0x35a), region = 56 }
   0xb   : > { %v2362_v0 = vld [vmem:[%s3340_s1 + $0xe4] ss:$16 sps:$4 sm:$0xff]   ;;  %v2364_v1 = vld [vmem:[%s3340_s1 + $0xec] ss:$16 sps:$4 sm:$0xff]   ;;  %v2642_v2 = vmov 0   ;;  %s3351_s14 = smov (!%p355_p3, %s2104_s14), 1 }
   0xc   : > { %616 = vmatprep.mubr.bf16.mxu0 %v2642_v2  ;;  %657 = vmatprep.mubr.bf16.mxu1 %v2642_v2  ;;  %v2366_v3 = vld [vmem:[%s3340_s1 + $0xe0] ss:$16 sps:$4 sm:$0xff]   ;;  %v2367_v4 = vld [vmem:[%s3340_s1 + $0xe8] ss:$16 sps:$4 sm:$0xff]   ;;  %v2368_v5 = vld [vmem:[%s3340_s1 + $0xc4] ss:$16 sps:$4 sm:$0xff]  }
   0xd   : > { %584 = vmatprep.subr.bf16.mxu0 %v2362_v0  ;;  %625 = vmatprep.subr.bf16.mxu1 %v2364_v1  ;;  %v2370_v6 = vld [vmem:[%s3340_s1 + $0xcc] ss:$16 sps:$4 sm:$0xff]   ;;  %v2372_v7 = vld [vmem:[%s3340_s1 + $0xc0] ss:$16 sps:$4 sm:$0xff]   ;;  %v2373_v8 = vld [vmem:[%s3340_s1 + $0xc8] ss:$16 sps:$4 sm:$0xff]  }
   0xe   : > { %585 = vmatpush1.bf16.msra.mxu0 %v2366_v3  ;;  %626 = vmatpush1.bf16.msra.mxu1 %v2367_v4  ;;  %v2374_v9 = vld [vmem:[%s3340_s1 + $0xa4] ss:$16 sps:$4 sm:$0xff]   ;;  %v2376_v10 = vld [vmem:[%s3340_s1 + $0xac] ss:$16 sps:$4 sm:$0xff]   ;;  %v2378_v11 = vld [vmem:[%s3340_s1 + $0xa0] ss:$16 sps:$4 sm:$0xff]  }
   0xf   : > { %586 = vmatprep.subr.bf16.mxu0 %v2368_v5  ;;  %627 = vmatprep.subr.bf16.mxu1 %v2370_v6  ;;  %v2379_v12 = vld [vmem:[%s3340_s1 + $0xa8] ss:$16 sps:$4 sm:$0xff]   ;;  %v2380_v13 = vld [vmem:[%s3340_s1 + $0x84] ss:$16 sps:$4 sm:$0xff]   ;;  %v2382_v14 = vld [vmem:[%s3340_s1 + $0x8c] ss:$16 sps:$4 sm:$0xff]  }
  0x10   : > { %v2384_v15 = vld [vmem:[%s3340_s1 + $0x80] ss:$16 sps:$4 sm:$0xff]   ;;  %v2385_v16 = vld [vmem:[%s3340_s1 + $0x88] ss:$16 sps:$4 sm:$0xff]   ;;  %v2386_v17 = vld [vmem:[%s3340_s1 + $0x64] ss:$16 sps:$4 sm:$0xff]  }
  0x11   : > { %v2388_v18 = vld [vmem:[%s3340_s1 + $0x6c] ss:$16 sps:$4 sm:$0xff]   ;;  %v2390_v19 = vld [vmem:[%s3340_s1 + $0x60] ss:$16 sps:$4 sm:$0xff]   ;;  %v2391_v20 = vld [vmem:[%s3340_s1 + $0x68] ss:$16 sps:$4 sm:$0xff]  }
  0x12   : > { %587 = vmatpush1.bf16.msra.mxu0 %v2372_v7  ;;  %628 = vmatpush1.bf16.msra.mxu1 %v2373_v8  ;;  %v2392_v21 = vld [vmem:[%s3340_s1 + $0x44] ss:$16 sps:$4 sm:$0xff]   ;;  %v2394_v22 = vld [vmem:[%s3340_s1 + $0x4c] ss:$16 sps:$4 sm:$0xff]   ;;  %v2396_v23 = vld [vmem:[%s3340_s1 + $0x40] ss:$16 sps:$4 sm:$0xff]  }
  0x13   : > { %588 = vmatprep.subr.bf16.mxu0 %v2374_v9  ;;  %629 = vmatprep.subr.bf16.mxu1 %v2376_v10  ;;  %v2397_v24 = vld [vmem:[%s3340_s1 + $0x48] ss:$16 sps:$4 sm:$0xff]   ;;  %v2398_v25 = vld [vmem:[%s3340_s1 + $0x24] ss:$16 sps:$4 sm:$0xff]   ;;  %v2400_v26 = vld [vmem:[%s3340_s1 + $0x2c] ss:$16 sps:$4 sm:$0xff]  }
  0x14   : > { %v2402_v27 = vld [vmem:[%s3340_s1 + $0x20] ss:$16 sps:$4 sm:$0xff]   ;;  %v2403_v28 = vld [vmem:[%s3340_s1 + $0x28] ss:$16 sps:$4 sm:$0xff]   ;;  %s2109_s17 = sshll.u32 %s3351_s14, 2  ;;  %s2308_s23 = sshll.u32 %s3351_s14, 4 }
  0x15   : > { %v2404_v29 = vld [vmem:[%s3340_s1 + $0x4] ss:$16 sps:$4 sm:$0xff]   ;;  %v2406_v30 = vld [vmem:[%s3340_s1 + $0xc] ss:$16 sps:$4 sm:$0xff]   ;;  %v2408_v31 = vld [vmem:[%s3340_s1] ss:$16 sps:$4 sm:$0xff]   ;;  %s358_s26 = scalar_lea.vmem %s3339_s0, %s2109_s17 }
  0x16   : > { %589 = vmatpush1.bf16.msra.mxu0 %v2378_v11  ;;  %630 = vmatpush1.bf16.msra.mxu1 %v2379_v12  ;;  %v2409_v32 = vld [vmem:[%s3340_s1 + $0x8] ss:$16 sps:$4 sm:$0xff]   ;;  %v2412_v33 = vld [vmem:[%s3342_s3 + $0x74] ss:$8 sps:$4 sm:$0xff]   ;;  %v369_v35 = vld [vmem:[%s358_s26] sm:$0xf]  ;;  %s363_s26 = scalar_lea.vmem %s3348_s9, %s2308_s23 }
  0x17   : > { %590 = vmatprep.subr.bf16.mxu0 %v2380_v13  ;;  %631 = vmatprep.subr.bf16.mxu1 %v2382_v14  ;;  %v2415_v34 = vld [vmem:[%s3342_s3 + $0x174] ss:$8 sps:$4 sm:$0xff]   ;;  %v2410_v36 = vld [vmem:[%s3342_s3 + $0x70] ss:$8 sps:$4 sm:$0xff]   ;;  %v2418_v38 = vld [vmem:[%s3342_s3 + $0x64] ss:$8 sps:$4 sm:$0xff]  }
  0x18   : > { %v2413_v37 = vld [vmem:[%s3342_s3 + $0x170] ss:$8 sps:$4 sm:$0xff]   ;;  %v2421_v39 = vld [vmem:[%s3342_s3 + $0x164] ss:$8 sps:$4 sm:$0xff]   ;;  %v2416_v40 = vld [vmem:[%s3342_s3 + $0x60] ss:$8 sps:$4 sm:$0xff]  }
  0x19   : > { %v2419_v41 = vld [vmem:[%s3342_s3 + $0x160] ss:$8 sps:$4 sm:$0xff]   ;;  %v2424_v42 = vld [vmem:[%s3342_s3 + $0x54] ss:$8 sps:$4 sm:$0xff]   ;;  %v2422_v44 = vld [vmem:[%s3342_s3 + $0x50] ss:$8 sps:$4 sm:$0xff]  }
  0x1a   : > { %591 = vmatpush1.bf16.msra.mxu0 %v2384_v15  ;;  %632 = vmatpush1.bf16.msra.mxu1 %v2385_v16  ;;  %v2427_v43 = vld [vmem:[%s3342_s3 + $0x154] ss:$8 sps:$4 sm:$0xff]   ;;  %v2425_v45 = vld [vmem:[%s3342_s3 + $0x150] ss:$8 sps:$4 sm:$0xff]   ;;  %v2430_v46 = vld [vmem:[%s3342_s3 + $0x44] ss:$8 sps:$4 sm:$0xff]  }
  0x1b   : > { %592 = vmatprep.subr.bf16.mxu0 %v2386_v17  ;;  %633 = vmatprep.subr.bf16.mxu1 %v2388_v18  ;;  %v2433_v47 = vld [vmem:[%s3342_s3 + $0x144] ss:$8 sps:$4 sm:$0xff]   ;;  %v2428_v48 = vld [vmem:[%s3342_s3 + $0x40] ss:$8 sps:$4 sm:$0xff]   ;;  %v2436_v50 = vld [vmem:[%s3342_s3 + $0x34] ss:$8 sps:$4 sm:$0xff]  }
  0x1c   : > { %v2431_v49 = vld [vmem:[%s3342_s3 + $0x140] ss:$8 sps:$4 sm:$0xff]   ;;  %v2439_v51 = vld [vmem:[%s3342_s3 + $0x134] ss:$8 sps:$4 sm:$0xff]   ;;  %v2434_v52 = vld [vmem:[%s3342_s3 + $0x30] ss:$8 sps:$4 sm:$0xff]  }
  0x1d   : > { %v2437_v53 = vld [vmem:[%s3342_s3 + $0x130] ss:$8 sps:$4 sm:$0xff]   ;;  %v2442_v54 = vld [vmem:[%s3342_s3 + $0x24] ss:$8 sps:$4 sm:$0xff]   ;;  %v2440_v56 = vld [vmem:[%s3342_s3 + $0x20] ss:$8 sps:$4 sm:$0xff]  }
  0x1e   : > { %593 = vmatpush1.bf16.msra.mxu0 %v2390_v19  ;;  %634 = vmatpush1.bf16.msra.mxu1 %v2391_v20  ;;  %v2445_v55 = vld [vmem:[%s3342_s3 + $0x124] ss:$8 sps:$4 sm:$0xff]   ;;  %v2443_v57 = vld [vmem:[%s3342_s3 + $0x120] ss:$8 sps:$4 sm:$0xff]   ;;  %v2448_v58 = vld [vmem:[%s3342_s3 + $0x14] ss:$8 sps:$4 sm:$0xff]  }
  0x1f   : > { %594 = vmatprep.subr.bf16.mxu0 %v2392_v21  ;;  %635 = vmatprep.subr.bf16.mxu1 %v2394_v22  ;;  %v2451_v59 = vld [vmem:[%s3342_s3 + $0x114] ss:$8 sps:$4 sm:$0xff]   ;;  %v2446_v60 = vld [vmem:[%s3342_s3 + $0x10] ss:$8 sps:$4 sm:$0xff]   ;;  %v2454_v62 = vld [vmem:[%s3342_s3 + $0x4] ss:$8 sps:$4 sm:$0xff]  }
  0x20   : > { %v2449_v61 = vld [vmem:[%s3342_s3 + $0x110] ss:$8 sps:$4 sm:$0xff]   ;;  %v2457_v63 = vld [vmem:[%s3342_s3 + $0x104] ss:$8 sps:$4 sm:$0xff]   ;;  %v2452_v0 = vld [vmem:[%s3342_s3] ss:$8 sps:$4 sm:$0xff]  }
  0x21   : > { %v2455_v1 = vld [vmem:[%s3342_s3 + $0x100] ss:$8 sps:$4 sm:$0xff]   ;;  %v2460_v2 = vld [vmem:[%s3342_s3 + $0xf4] ss:$8 sps:$4 sm:$0xff]   ;;  %v2458_v4 = vld [vmem:[%s3342_s3 + $0xf0] ss:$8 sps:$4 sm:$0xff]  }
  0x22   : > { %595 = vmatpush1.bf16.msra.mxu0 %v2396_v23  ;;  %636 = vmatpush1.bf16.msra.mxu1 %v2397_v24  ;;  %v2463_v3 = vld [vmem:[%s3342_s3 + $0x1f4] ss:$8 sps:$4 sm:$0xff]   ;;  %v2461_v5 = vld [vmem:[%s3342_s3 + $0x1f0] ss:$8 sps:$4 sm:$0xff]   ;;  %v2466_v6 = vld [vmem:[%s3342_s3 + $0xe4] ss:$8 sps:$4 sm:$0xff]  }
  0x23   : > { %596 = vmatprep.subr.bf16.mxu0 %v2398_v25  ;;  %637 = vmatprep.subr.bf16.mxu1 %v2400_v26  ;;  %v2469_v7 = vld [vmem:[%s3342_s3 + $0x1e4] ss:$8 sps:$4 sm:$0xff]   ;;  %v2464_v8 = vld [vmem:[%s3342_s3 + $0xe0] ss:$8 sps:$4 sm:$0xff]   ;;  %v2472_v10 = vld [vmem:[%s3342_s3 + $0xd4] ss:$8 sps:$4 sm:$0xff]  }
  0x24   : > { %v2467_v9 = vld [vmem:[%s3342_s3 + $0x1e0] ss:$8 sps:$4 sm:$0xff]   ;;  %v2475_v11 = vld [vmem:[%s3342_s3 + $0x1d4] ss:$8 sps:$4 sm:$0xff]   ;;  %v2470_v12 = vld [vmem:[%s3342_s3 + $0xd0] ss:$8 sps:$4 sm:$0xff]  }
  0x25   : > { %v2473_v13 = vld [vmem:[%s3342_s3 + $0x1d0] ss:$8 sps:$4 sm:$0xff]   ;;  %v2478_v14 = vld [vmem:[%s3342_s3 + $0xc4] ss:$8 sps:$4 sm:$0xff]   ;;  %v2476_v16 = vld [vmem:[%s3342_s3 + $0xc0] ss:$8 sps:$4 sm:$0xff]  }
  0x26   : > { %597 = vmatpush1.bf16.msra.mxu0 %v2402_v27  ;;  %638 = vmatpush1.bf16.msra.mxu1 %v2403_v28  ;;  %v2481_v15 = vld [vmem:[%s3342_s3 + $0x1c4] ss:$8 sps:$4 sm:$0xff]   ;;  %v2479_v17 = vld [vmem:[%s3342_s3 + $0x1c0] ss:$8 sps:$4 sm:$0xff]   ;;  %v2484_v18 = vld [vmem:[%s3342_s3 + $0xb4] ss:$8 sps:$4 sm:$0xff]  }
  0x27   : > { %598 = vmatprep.subr.bf16.mxu0 %v2404_v29  ;;  %639 = vmatprep.subr.bf16.mxu1 %v2406_v30  ;;  %v2487_v19 = vld [vmem:[%s3342_s3 + $0x1b4] ss:$8 sps:$4 sm:$0xff]   ;;  %v2482_v20 = vld [vmem:[%s3342_s3 + $0xb0] ss:$8 sps:$4 sm:$0xff]   ;;  %v2490_v22 = vld [vmem:[%s3342_s3 + $0xa4] ss:$8 sps:$4 sm:$0xff]  }
  0x28   : > { %v2485_v21 = vld [vmem:[%s3342_s3 + $0x1b0] ss:$8 sps:$4 sm:$0xff]   ;;  %v2493_v23 = vld [vmem:[%s3342_s3 + $0x1a4] ss:$8 sps:$4 sm:$0xff]   ;;  %v2488_v24 = vld [vmem:[%s3342_s3 + $0xa0] ss:$8 sps:$4 sm:$0xff]  }
  0x29   : > { %v2491_v25 = vld [vmem:[%s3342_s3 + $0x1a0] ss:$8 sps:$4 sm:$0xff]   ;;  %v2496_v26 = vld [vmem:[%s3342_s3 + $0x94] ss:$8 sps:$4 sm:$0xff]   ;;  %v2494_v28 = vld [vmem:[%s3342_s3 + $0x90] ss:$8 sps:$4 sm:$0xff]  }
  0x2a   : > { %599 = vmatpush1.bf16.msra.mxu0 %v2408_v31  ;;  %640 = vmatpush1.bf16.msra.mxu1 %v2409_v32  ;;  %v2499_v27 = vld [vmem:[%s3342_s3 + $0x194] ss:$8 sps:$4 sm:$0xff]   ;;  %v2497_v29 = vld [vmem:[%s3342_s3 + $0x190] ss:$8 sps:$4 sm:$0xff]   ;;  %v2500_v30 = vld [vmem:[%s3342_s3 + $0x80] ss:$8 sps:$4 sm:$0xff]  }
  0x2b   : > { %1078 = vmatprep.subr.bf16.mxu0 %v2412_v33  ;;  %1119 = vmatprep.subr.bf16.mxu1 %v2415_v34  ;;  %v2502_v31 = vld [vmem:[%s3342_s3 + $0x84] ss:$8 sps:$4 sm:$0xff]   ;;  %v2503_v32 = vld [vmem:[%s3342_s3 + $0x180] ss:$8 sps:$4 sm:$0xff]   ;;  %s2112_s19 = sshll.u32 %s3351_s14, 3 }
  0x2c   : > { %v2505_v33 = vld [vmem:[%s3342_s3 + $0x184] ss:$8 sps:$4 sm:$0xff]   ;;  %s367_s22 = scalar_lea.vmem %s3349_s10, %s2112_s19 }
  0x2d   : > { %617 = vmatmul.mubr.bf16.vlgmr.msra.gmra.mxu0 %v369_v35  ;;  %658 = vmatmul.mubr.bf16.vlgmr.msra.gmra.mxu1 %v369_v35  ;;  %v2508_v34 = vld [vmem:[%s3344_s5 + $0xe4] ss:$16 sps:$4 sm:$0xff]   ;;  %v2511_v35 = vld [vmem:[%s3344_s5 + $0xec] ss:$16 sps:$4 sm:$0xff]  }
  0x2e   : > { %1079 = vmatpush1.bf16.msra.mxu0 %v2410_v36  ;;  %1120 = vmatpush1.bf16.msra.mxu1 %v2413_v37  ;;  %v404_v36 = vlaneseq }
  0x2f   : > { %1080 = vmatprep.subr.bf16.mxu0 %v2418_v38  ;;  %1121 = vmatprep.subr.bf16.mxu1 %v2421_v39 }
  0x30   : > { %v3010_v37 = vshrl.u32 %v404_v36, 7  ;;  %v2551_v36 = vld [vmem:[%s3344_s5 + $0x8] ss:$16 sps:$4 sm:$0xff]  }
  0x32   : > { %1081 = vmatpush1.bf16.msra.mxu0 %v2416_v40  ;;  %1122 = vmatpush1.bf16.msra.mxu1 %v2419_v41  ;;  %v3013_v38 = vsub.s32 0, %v3010_v37  ;;  %v414_v39 = vsub.s32 2, %v3010_v37  ;;  %v402_v40 = vld [vmem:[%s3341_s2] sm:$0xf]  ;;  %v3020_v41 = vsub.s32 1, %v3010_v37 }
  0x33   : > { %1082 = vmatprep.subr.bf16.mxu0 %v2424_v42  ;;  %1123 = vmatprep.subr.bf16.mxu1 %v2427_v43  ;;  %v418_v42 = vsub.s32 3, %v3010_v37 }
  0x34   : > { %v407_v43 = vrot.slane %v402_v40, %v3013_v38 }
  0x36   : > { %1083 = vmatpush1.bf16.msra.mxu0 %v2422_v44  ;;  %1124 = vmatpush1.bf16.msra.mxu1 %v2425_v45  ;;  %v415_v44 = vrot.slane %v402_v40, %v414_v39 }
  0x37   : > { %1084 = vmatprep.subr.bf16.mxu0 %v2430_v46  ;;  %1125 = vmatprep.subr.bf16.mxu1 %v2433_v47  ;;  %v411_v47 = vrot.slane %v402_v40, %v3020_v41 }
  0x3a   : > { %1085 = vmatpush1.bf16.msra.mxu0 %v2428_v48  ;;  %1126 = vmatpush1.bf16.msra.mxu1 %v2431_v49  ;;  %v419_v48 = vrot.slane %v402_v40, %v418_v42  ;;  %v2556_v40 = vld [vmem:[%s3344_s5 + $0x1e4] ss:$16 sps:$4 sm:$0xff]  }
  0x3b   : > { %1086 = vmatprep.subr.bf16.mxu0 %v2436_v50  ;;  %1127 = vmatprep.subr.bf16.mxu1 %v2439_v51 }
  0x3e   : > { %1087 = vmatpush1.bf16.msra.mxu0 %v2434_v52  ;;  %1128 = vmatpush1.bf16.msra.mxu1 %v2437_v53 }
  0x3f   : > { %1088 = vmatprep.subr.bf16.mxu0 %v2442_v54  ;;  %1129 = vmatprep.subr.bf16.mxu1 %v2445_v55 }
  0x42   : > { %1089 = vmatpush1.bf16.msra.mxu0 %v2440_v56  ;;  %1130 = vmatpush1.bf16.msra.mxu1 %v2443_v57 }
  0x43   : > { %1090 = vmatprep.subr.bf16.mxu0 %v2448_v58  ;;  %1131 = vmatprep.subr.bf16.mxu1 %v2451_v59 }
  0x46   : > { %1091 = vmatpush1.bf16.msra.mxu0 %v2446_v60  ;;  %1132 = vmatpush1.bf16.msra.mxu1 %v2449_v61 }
  0x47   : > { %1092 = vmatprep.subr.bf16.mxu0 %v2454_v62  ;;  %1133 = vmatprep.subr.bf16.mxu1 %v2457_v63 }
  0x4a   : > { %1093 = vmatpush1.bf16.msra.mxu0 %v2452_v0  ;;  %1134 = vmatpush1.bf16.msra.mxu1 %v2455_v1 }
  0x4b   : > { %1094 = vmatprep.subr.bf16.mxu0 %v2460_v2  ;;  %1135 = vmatprep.subr.bf16.mxu1 %v2463_v3 }
  0x4e   : > { %1095 = vmatpush2.bf16.msra.mxu0 %v2458_v4  ;;  %1136 = vmatpush2.bf16.msra.mxu1 %v2461_v5  ;;  %v2506_v4 = vld [vmem:[%s3344_s5 + $0xe0] ss:$16 sps:$4 sm:$0xff]  }
  0x4f   : > { %1096 = vmatprep.subr.bf16.mxu0 %v2466_v6  ;;  %1137 = vmatprep.subr.bf16.mxu1 %v2469_v7  ;;  %v2509_v7 = vld [vmem:[%s3344_s5 + $0xe8] ss:$16 sps:$4 sm:$0xff]  }
  0x52   : > { %1097 = vmatpush2.bf16.msra.mxu0 %v2464_v8  ;;  %1138 = vmatpush2.bf16.msra.mxu1 %v2467_v9  ;;  %v2514_v8 = vld [vmem:[%s3344_s5 + $0xc4] ss:$16 sps:$4 sm:$0xff]  }
  0x53   : > { %1098 = vmatprep.subr.bf16.mxu0 %v2472_v10  ;;  %1139 = vmatprep.subr.bf16.mxu1 %v2475_v11  ;;  %v2517_v10 = vld [vmem:[%s3344_s5 + $0xcc] ss:$16 sps:$4 sm:$0xff]   ;;  %v2512_v11 = vld [vmem:[%s3344_s5 + $0xc0] ss:$16 sps:$4 sm:$0xff]  }
  0x56   : > { %1099 = vmatpush2.bf16.msra.mxu0 %v2470_v12  ;;  %1140 = vmatpush2.bf16.msra.mxu1 %v2473_v13  ;;  %v2515_v12 = vld [vmem:[%s3344_s5 + $0xc8] ss:$16 sps:$4 sm:$0xff]   ;;  %v2520_v13 = vld [vmem:[%s3344_s5 + $0xa4] ss:$16 sps:$4 sm:$0xff]  }
  0x57   : > { %1100 = vmatprep.subr.bf16.mxu0 %v2478_v14  ;;  %1141 = vmatprep.subr.bf16.mxu1 %v2481_v15  ;;  %v2523_v14 = vld [vmem:[%s3344_s5 + $0xac] ss:$16 sps:$4 sm:$0xff]   ;;  %v2518_v15 = vld [vmem:[%s3344_s5 + $0xa0] ss:$16 sps:$4 sm:$0xff]  }
  0x5a   : > { %1101 = vmatpush2.bf16.msra.mxu0 %v2476_v16  ;;  %1142 = vmatpush2.bf16.msra.mxu1 %v2479_v17  ;;  %v2521_v16 = vld [vmem:[%s3344_s5 + $0xa8] ss:$16 sps:$4 sm:$0xff]   ;;  %v2526_v17 = vld [vmem:[%s3344_s5 + $0x84] ss:$16 sps:$4 sm:$0xff]  }
  0x5b   : > { %1102 = vmatprep.subr.bf16.mxu0 %v2484_v18  ;;  %1143 = vmatprep.subr.bf16.mxu1 %v2487_v19  ;;  %v2529_v18 = vld [vmem:[%s3344_s5 + $0x8c] ss:$16 sps:$4 sm:$0xff]   ;;  %v2524_v19 = vld [vmem:[%s3344_s5 + $0x80] ss:$16 sps:$4 sm:$0xff]  }
  0x5e   : > { %1103 = vmatpush2.bf16.msra.mxu0 %v2482_v20  ;;  %1144 = vmatpush2.bf16.msra.mxu1 %v2485_v21  ;;  %v2527_v20 = vld [vmem:[%s3344_s5 + $0x88] ss:$16 sps:$4 sm:$0xff]   ;;  %v2532_v21 = vld [vmem:[%s3344_s5 + $0x64] ss:$16 sps:$4 sm:$0xff]  }
  0x5f   : > { %1104 = vmatprep.subr.bf16.mxu0 %v2490_v22  ;;  %1145 = vmatprep.subr.bf16.mxu1 %v2493_v23  ;;  %v2535_v22 = vld [vmem:[%s3344_s5 + $0x6c] ss:$16 sps:$4 sm:$0xff]   ;;  %v2530_v23 = vld [vmem:[%s3344_s5 + $0x60] ss:$16 sps:$4 sm:$0xff]  }
  0x62   : > { %1105 = vmatpush2.bf16.msra.mxu0 %v2488_v24  ;;  %1146 = vmatpush2.bf16.msra.mxu1 %v2491_v25  ;;  %v2533_v24 = vld [vmem:[%s3344_s5 + $0x68] ss:$16 sps:$4 sm:$0xff]   ;;  %v2538_v25 = vld [vmem:[%s3344_s5 + $0x44] ss:$16 sps:$4 sm:$0xff]  }
  0x63   : > { %1106 = vmatprep.subr.bf16.mxu0 %v2496_v26  ;;  %1147 = vmatprep.subr.bf16.mxu1 %v2499_v27  ;;  %v2541_v26 = vld [vmem:[%s3344_s5 + $0x4c] ss:$16 sps:$4 sm:$0xff]   ;;  %v2536_v27 = vld [vmem:[%s3344_s5 + $0x40] ss:$16 sps:$4 sm:$0xff]  }
  0x66   : > { %1107 = vmatpush2.bf16.msra.mxu0 %v2494_v28  ;;  %1148 = vmatpush2.bf16.msra.mxu1 %v2497_v29  ;;  %v2539_v28 = vld [vmem:[%s3344_s5 + $0x48] ss:$16 sps:$4 sm:$0xff]   ;;  %v2544_v29 = vld [vmem:[%s3344_s5 + $0x24] ss:$16 sps:$4 sm:$0xff]  }
  0x67   : > { %1108 = vmatprep.subr.bf16.mxu0 %v2502_v31  ;;  %1149 = vmatprep.subr.bf16.mxu1 %v2505_v33  ;;  %v2542_v31 = vld [vmem:[%s3344_s5 + $0x20] ss:$16 sps:$4 sm:$0xff]   ;;  %v2550_v33 = vld [vmem:[%s3344_s5 + $0x4] ss:$16 sps:$4 sm:$0xff]  }
  0x6a   : > { %1109 = vmatpush2.bf16.msra.mxu0 %v2500_v30  ;;  %1150 = vmatpush2.bf16.msra.mxu1 %v2503_v32  ;;  %v2547_v30 = vld [vmem:[%s3344_s5 + $0x2c] ss:$16 sps:$4 sm:$0xff]   ;;  %v2545_v32 = vld [vmem:[%s3344_s5 + $0x28] ss:$16 sps:$4 sm:$0xff]  }
  0x6b   : > { %1576 = vmatprep.subr.bf16.mxu0 %v2508_v34  ;;  %1617 = vmatprep.subr.bf16.mxu1 %v2511_v35  ;;  %v2553_v34 = vld [vmem:[%s3344_s5 + $0xc] ss:$16 sps:$4 sm:$0xff]   ;;  %v2548_v35 = vld [vmem:[%s3344_s5] ss:$16 sps:$4 sm:$0xff]  }
  0xed   : > { %v618_v45 = vpop.f32.mrf.mxu0  ;;  %v659_v46 = vpop.f32.mrf.mxu1 }
  0xee   : > { %v619_v49 = vadd.f32 %v618_v45, %v407_v43  ;;  %v660_v50 = vadd.f32 %v659_v46, %v415_v44  ;;  %v2559_v43 = vld [vmem:[%s3344_s5 + $0x1ec] ss:$16 sps:$4 sm:$0xff]   ;;  %v2554_v44 = vld [vmem:[%s3344_s5 + $0x1e0] ss:$16 sps:$4 sm:$0xff]   ;;  %v2557_v45 = vld [vmem:[%s3344_s5 + $0x1e8] ss:$16 sps:$4 sm:$0xff]  }
  0xef   : > { %v620_v51 = vpop.f32.mrf.mxu0  ;;  %v661_v52 = vpop.f32.mrf.mxu1  ;;  %v2562_v46 = vld [vmem:[%s3344_s5 + $0x1c4] ss:$16 sps:$4 sm:$0xff]  }
  0xf0   : > { %v670_v53 = vmul.f32 0.1, %v619_v49  ;;  %vm666_vm0 = vcmp.ge.f32.partialorder %v619_v49, 0.0  ;;  %v672_v54 = vmul.f32 0.1, %v660_v50  ;;  %v621_v55 = vadd.f32 %v620_v51, %v411_v47 }
  0xf1   : > { %v662_v56 = vadd.f32 %v661_v52, %v419_v48  ;;  %v622_v57 = vpop.f32.mrf.mxu0  ;;  %v663_v58 = vpop.f32.mrf.mxu1  ;;  %vm668_vm1 = vcmp.ge.f32.partialorder %v660_v50, 0.0  ;;  %v2565_v47 = vld [vmem:[%s3344_s5 + $0x1cc] ss:$16 sps:$4 sm:$0xff]   ;;  %v2560_v48 = vld [vmem:[%s3344_s5 + $0x1c0] ss:$16 sps:$4 sm:$0xff]  }
  0xf2   : > { %vm667_vm2 = vcmp.ge.f32.partialorder %v621_v55, 0.0  ;;  %v671_v59 = vmul.f32 0.1, %v621_v55  ;;  %v674_v62 = vsel %vm666_vm0, %v619_v49, %v670_v53  ;;  %v676_v0 = vsel %vm668_vm1, %v660_v50, %v672_v54  ;;  %v2563_v49 = vld [vmem:[%s3344_s5 + $0x1c8] ss:$16 sps:$4 sm:$0xff]  }
  0xf3   : > { %v623_v60 = vpop.f32.mrf.mxu0  ;;  %v664_v61 = vpop.f32.mrf.mxu1  ;;  %vm669_vm3 = vcmp.ge.f32.partialorder %v662_v56, 0.0  ;;  %v673_v63 = vmul.f32 0.1, %v662_v56  ;;  %v678_v5 = vpack.c.bf16 %v674_v62, %v674_v62  ;;  %v680_v9 = vpack.c.bf16 %v676_v0, %v676_v0  ;;  %v2568_v50 = vld [vmem:[%s3344_s5 + $0x1a4] ss:$16 sps:$4 sm:$0xff]  }
  0xf4   : > { %v675_v1 = vsel %vm667_vm2, %v621_v55, %v671_v59  ;;  %v2571_v51 = vld [vmem:[%s3344_s5 + $0x1ac] ss:$16 sps:$4 sm:$0xff]   ;;  %v2566_v52 = vld [vmem:[%s3344_s5 + $0x1a0] ss:$16 sps:$4 sm:$0xff]   ;;  %v2569_v53 = vld [vmem:[%s3344_s5 + $0x1a8] ss:$16 sps:$4 sm:$0xff]  }
  0xf5   : > { %v679_v2 = vpack.c.bf16 %v675_v1, %v675_v1  ;;  %v677_v3 = vsel %vm669_vm3, %v662_v56, %v673_v63  ;;  %v2574_v54 = vld [vmem:[%s3344_s5 + $0x184] ss:$16 sps:$4 sm:$0xff]   ;;  %v2577_v55 = vld [vmem:[%s3344_s5 + $0x18c] ss:$16 sps:$4 sm:$0xff]   ;;  %v2572_v56 = vld [vmem:[%s3344_s5 + $0x180] ss:$16 sps:$4 sm:$0xff]  }
  0xf6   : > { %v681_v6 = vpack.c.bf16 %v677_v3, %v677_v3  ;;  %v2575_v57 = vld [vmem:[%s3344_s5 + $0x188] ss:$16 sps:$4 sm:$0xff]   ;;  %v2580_v58 = vld [vmem:[%s3344_s5 + $0x164] ss:$16 sps:$4 sm:$0xff]   ;;  %v2583_v59 = vld [vmem:[%s3344_s5 + $0x16c] ss:$16 sps:$4 sm:$0xff]  }
  0xf7   : > { %1110 = vmatprep.mubr.bf16.mxu0 %v679_v2  ;;  %v2578_v60 = vld [vmem:[%s3344_s5 + $0x160] ss:$16 sps:$4 sm:$0xff]   ;;  %v2581_v61 = vld [vmem:[%s3344_s5 + $0x168] ss:$16 sps:$4 sm:$0xff]   ;;  %v2586_v62 = vld [vmem:[%s3344_s5 + $0x144] ss:$16 sps:$4 sm:$0xff]  }
  0xf8   : > { %1151 = vmatprep.mubr.bf16.mxu1 %v681_v6  ;;  %1111 = vmatmul.mubr.bf16.vlgmr.msra.gmra.mxu0 %v678_v5  ;;  %v2589_v63 = vld [vmem:[%s3344_s5 + $0x14c] ss:$16 sps:$4 sm:$0xff]   ;;  %v2584_v0 = vld [vmem:[%s3344_s5 + $0x140] ss:$16 sps:$4 sm:$0xff]   ;;  %v2587_v1 = vld [vmem:[%s3344_s5 + $0x148] ss:$16 sps:$4 sm:$0xff]  }
  0xf9   : > { %1152 = vmatmul.mubr.bf16.vlgmr.msra.gmra.mxu1 %v680_v9  ;;  %1577 = vmatpush1.bf16.msra.mxu0 %v2506_v4  ;;  %v2592_v2 = vld [vmem:[%s3344_s5 + $0x124] ss:$16 sps:$4 sm:$0xff]   ;;  %v2595_v3 = vld [vmem:[%s3344_s5 + $0x12c] ss:$16 sps:$4 sm:$0xff]   ;;  %v2590_v4 = vld [vmem:[%s3344_s5 + $0x120] ss:$16 sps:$4 sm:$0xff]  }
  0xfa   : > { %1618 = vmatpush1.bf16.msra.mxu1 %v2509_v7  ;;  %1578 = vmatprep.subr.bf16.mxu0 %v2514_v8  ;;  %v2593_v5 = vld [vmem:[%s3344_s5 + $0x128] ss:$16 sps:$4 sm:$0xff]   ;;  %v2596_v6 = vld [vmem:[%s3344_s5 + $0x100] ss:$16 sps:$4 sm:$0xff]   ;;  %v2598_v7 = vld [vmem:[%s3344_s5 + $0x104] ss:$16 sps:$4 sm:$0xff]  }
  0xfb   : > { %1619 = vmatprep.subr.bf16.mxu1 %v2517_v10  ;;  %v2599_v8 = vld [vmem:[%s3344_s5 + $0x108] ss:$16 sps:$4 sm:$0xff]   ;;  %v2601_v9 = vld [vmem:[%s3344_s5 + $0x10c] ss:$16 sps:$4 sm:$0xff]  }
  0xfc   : > { %v2602_v10 = vld [vmem:[%s3346_s7 + $0x78] sm:$0xff]  }
  0xfd   : > { %1579 = vmatpush1.bf16.msra.mxu0 %v2512_v11  ;;  %v2603_v11 = vld [vmem:[%s3346_s7 + $0xf8] sm:$0xff]  }
  0xfe   : > { %1620 = vmatpush1.bf16.msra.mxu1 %v2515_v12  ;;  %1580 = vmatprep.subr.bf16.mxu0 %v2520_v13  ;;  %v746_v12 = vld [vmem:[%s3343_s4] sm:$0x3] }
  0xff   : > { %1621 = vmatprep.subr.bf16.mxu1 %v2523_v14  ;;  %v751_v13 = vrot.slane %v746_v12, %v3013_v38  ;;  %v755_v14 = vrot.slane %v746_v12, %v3020_v41 }
 0x101   : > { %1581 = vmatpush1.bf16.msra.mxu0 %v2518_v15 }
 0x102   : > { %1622 = vmatpush1.bf16.msra.mxu1 %v2521_v16  ;;  %1582 = vmatprep.subr.bf16.mxu0 %v2526_v17 }
 0x103   : > { %1623 = vmatprep.subr.bf16.mxu1 %v2529_v18 }
 0x105   : > { %1583 = vmatpush1.bf16.msra.mxu0 %v2524_v19 }
 0x106   : > { %1624 = vmatpush1.bf16.msra.mxu1 %v2527_v20  ;;  %1584 = vmatprep.subr.bf16.mxu0 %v2532_v21 }
 0x107   : > { %1625 = vmatprep.subr.bf16.mxu1 %v2535_v22 }
 0x109   : > { %1585 = vmatpush1.bf16.msra.mxu0 %v2530_v23 }
 0x10a   : > { %1626 = vmatpush1.bf16.msra.mxu1 %v2533_v24  ;;  %1586 = vmatprep.subr.bf16.mxu0 %v2538_v25 }
 0x10b   : > { %1627 = vmatprep.subr.bf16.mxu1 %v2541_v26 }
 0x10d   : > { %1587 = vmatpush1.bf16.msra.mxu0 %v2536_v27 }
 0x10e   : > { %1628 = vmatpush1.bf16.msra.mxu1 %v2539_v28  ;;  %1588 = vmatprep.subr.bf16.mxu0 %v2544_v29 }
 0x10f   : > { %1629 = vmatprep.subr.bf16.mxu1 %v2547_v30 }
 0x111   : > { %1589 = vmatpush1.bf16.msra.mxu0 %v2542_v31 }
 0x112   : > { %1630 = vmatpush1.bf16.msra.mxu1 %v2545_v32  ;;  %1590 = vmatprep.subr.bf16.mxu0 %v2550_v33  ;;  %v2604_v32 = vld [vmem:[%s3346_s7 + $0x38] sm:$0xff]  }
 0x113   : > { %1631 = vmatprep.subr.bf16.mxu1 %v2553_v34  ;;  %v2605_v33 = vld [vmem:[%s3346_s7 + $0xb8] sm:$0xff]  }
 0x115   : > { %1591 = vmatpush1.bf16.msra.mxu0 %v2548_v35  ;;  %v2606_v35 = vld [vmem:[%s3346_s7 + $0x70] sm:$0xff]  }
 0x116   : > { %1632 = vmatpush1.bf16.msra.mxu1 %v2551_v36  ;;  %1592 = vmatprep.subr.bf16.mxu0 %v2556_v40  ;;  %v2607_v36 = vld [vmem:[%s3346_s7 + $0xf0] sm:$0xff]  }
 0x117   : > { %1633 = vmatprep.subr.bf16.mxu1 %v2559_v43  ;;  %v2608_v40 = vld [vmem:[%s3346_s7 + $0x30] sm:$0xff]  }
 0x118   : > { %v2609_v43 = vld [vmem:[%s3346_s7 + $0xb0] sm:$0xff]  }
 0x119   : > { %1593 = vmatpush2.bf16.msra.mxu0 %v2554_v44  ;;  %v2610_v44 = vld [vmem:[%s3346_s7 + $0x68] sm:$0xff]  }
 0x11a   : > { %1634 = vmatpush2.bf16.msra.mxu1 %v2557_v45  ;;  %1594 = vmatprep.subr.bf16.mxu0 %v2562_v46  ;;  %v2611_v45 = vld [vmem:[%s3346_s7 + $0xe8] sm:$0xff]  }
 0x11b   : > { %1635 = vmatprep.subr.bf16.mxu1 %v2565_v47  ;;  %v2612_v46 = vld [vmem:[%s3346_s7 + $0x28] sm:$0xff]  }
 0x11c   : > { %v2613_v47 = vld [vmem:[%s3346_s7 + $0xa8] sm:$0xff]  }
 0x11d   : > { %1595 = vmatpush2.bf16.msra.mxu0 %v2560_v48  ;;  %v2614_v48 = vld [vmem:[%s3346_s7 + $0x60] sm:$0xff]  }
 0x11e   : > { %1636 = vmatpush2.bf16.msra.mxu1 %v2563_v49  ;;  %1596 = vmatprep.subr.bf16.mxu0 %v2568_v50  ;;  %v2615_v49 = vld [vmem:[%s3346_s7 + $0xe0] sm:$0xff]  }
 0x11f   : > { %1637 = vmatprep.subr.bf16.mxu1 %v2571_v51  ;;  %v2616_v50 = vld [vmem:[%s3346_s7 + $0x20] sm:$0xff]  }
 0x120   : > { %v2617_v51 = vld [vmem:[%s3346_s7 + $0xa0] sm:$0xff]  }
 0x121   : > { %1597 = vmatpush2.bf16.msra.mxu0 %v2566_v52  ;;  %v2618_v52 = vld [vmem:[%s3346_s7 + $0x58] sm:$0xff]  }
 0x122   : > { %1638 = vmatpush2.bf16.msra.mxu1 %v2569_v53  ;;  %1598 = vmatprep.subr.bf16.mxu0 %v2574_v54  ;;  %v2619_v53 = vld [vmem:[%s3346_s7 + $0xd8] sm:$0xff]  }
 0x123   : > { %1639 = vmatprep.subr.bf16.mxu1 %v2577_v55  ;;  %v2620_v54 = vld [vmem:[%s3346_s7 + $0x18] sm:$0xff]  }
 0x124   : > { %v2621_v55 = vld [vmem:[%s3346_s7 + $0x98] sm:$0xff]  }
 0x125   : > { %1599 = vmatpush2.bf16.msra.mxu0 %v2572_v56  ;;  %v2622_v56 = vld [vmem:[%s3346_s7 + $0x50] sm:$0xff]  }
 0x126   : > { %1640 = vmatpush2.bf16.msra.mxu1 %v2575_v57  ;;  %1600 = vmatprep.subr.bf16.mxu0 %v2580_v58  ;;  %v2623_v57 = vld [vmem:[%s3346_s7 + $0xd0] sm:$0xff]  }
 0x127   : > { %1641 = vmatprep.subr.bf16.mxu1 %v2583_v59  ;;  %v2624_v58 = vld [vmem:[%s3346_s7 + $0x10] sm:$0xff]  }
 0x128   : > { %v2625_v59 = vld [vmem:[%s3346_s7 + $0x90] sm:$0xff]  }
 0x129   : > { %1601 = vmatpush2.bf16.msra.mxu0 %v2578_v60  ;;  %v2626_v60 = vld [vmem:[%s3346_s7 + $0x48] sm:$0xff]  }
 0x12a   : > { %1642 = vmatpush2.bf16.msra.mxu1 %v2581_v61  ;;  %1602 = vmatprep.subr.bf16.mxu0 %v2586_v62  ;;  %v2627_v61 = vld [vmem:[%s3346_s7 + $0xc8] sm:$0xff]  }
 0x12b   : > { %1643 = vmatprep.subr.bf16.mxu1 %v2589_v63  ;;  %v2628_v62 = vld [vmem:[%s3346_s7 + $0x8] sm:$0xff]  }
 0x12c   : > { %v2629_v63 = vld [vmem:[%s3346_s7 + $0x88] sm:$0xff]  }
 0x12d   : > { %1603 = vmatpush2.bf16.msra.mxu0 %v2584_v0  ;;  %v2630_v0 = vld [vmem:[%s3346_s7 + $0x40] sm:$0xff]  }
 0x12e   : > { %1644 = vmatpush2.bf16.msra.mxu1 %v2587_v1  ;;  %1604 = vmatprep.subr.bf16.mxu0 %v2592_v2  ;;  %v2631_v1 = vld [vmem:[%s3346_s7 + $0xc0] sm:$0xff]  }
 0x12f   : > { %1645 = vmatprep.subr.bf16.mxu1 %v2595_v3  ;;  %v2632_v2 = vld [vmem:[%s3346_s7] sm:$0xff]  }
 0x130   : > { %v2633_v3 = vld [vmem:[%s3346_s7 + $0x80] sm:$0xff]  }
 0x131   : > { %1605 = vmatpush2.bf16.msra.mxu0 %v2590_v4  ;;  %v1234_v4 = vld [vmem:[%s3345_s6] sm:$0xf] }
 0x132   : > { %1646 = vmatpush2.bf16.msra.mxu1 %v2593_v5  ;;  %1606 = vmatprep.subr.bf16.mxu0 %v2598_v7  ;;  %v1239_v5 = vrot.slane %v1234_v4, %v3013_v38 }
 0x133   : > { %1647 = vmatprep.subr.bf16.mxu1 %v2601_v9  ;;  %v1243_v9 = vrot.slane %v1234_v4, %v3020_v41 }
 0x135   : > { %1607 = vmatpush2.bf16.msra.mxu0 %v2596_v6  ;;  %v1247_v6 = vrot.slane %v1234_v4, %v414_v39 }
 0x136   : > { %1648 = vmatpush2.bf16.msra.mxu1 %v2599_v8  ;;  %2309 = vmatprep.subr.bf16.mxu0 %v2602_v10  ;;  %v1251_v10 = vrot.slane %v1234_v4, %v418_v42 }
 0x137   : > { %2331 = vmatprep.subr.bf16.mxu1 %v2603_v11 }
 0x1b8   : > { %v1112_v15 = vpop.f32.mrf.mxu0 }
 0x1b9   : > { %v1113_v16 = vadd.f32 %v1112_v15, %v751_v13  ;;  %v1153_v17 = vpop.f32.mrf.mxu1 }
 0x1ba   : > { %v1114_v18 = vpop.f32.mrf.mxu0 }
 0x1bb   : > { %v1154_v19 = vadd.f32 %v1153_v17, %v1113_v16  ;;  %v1115_v20 = vadd.f32 %v1114_v18, %v755_v14  ;;  %v1155_v21 = vpop.f32.mrf.mxu1 }
 0x1bc   : > { %v1116_v22 = vpop.f32.mrf.mxu0 }
 0x1bd   : > { %vm1160_vm4 = vcmp.ge.f32.partialorder %v1154_v19, 0.0  ;;  %v1162_v23 = vmul.f32 0.1, %v1154_v19  ;;  %v1156_v24 = vadd.f32 %v1155_v21, %v1115_v20  ;;  %v1157_v25 = vpop.f32.mrf.mxu1 }
 0x1be   : > { %v1117_v26 = vpop.f32.mrf.mxu0 }
 0x1bf   : > { %v1164_v27 = vsel %vm1160_vm4, %v1154_v19, %v1162_v23  ;;  %vm1161_vm5 = vcmp.ge.f32.partialorder %v1156_v24, 0.0  ;;  %v1163_v28 = vmul.f32 0.1, %v1156_v24  ;;  %v1158_v29 = vpop.f32.mrf.mxu1 }
 0x1c0   : > { %1166 = vst [vmem:[%s363_s26] sm:$0xff] %v1164_v27  ;;  %v1168_v34 = vpack.c.bf16 %v1164_v27, %v1164_v27 }
 0x1c1   : > { %v1165_v30 = vsel %vm1161_vm5, %v1156_v24, %v1163_v28 }
 0x1c2   : > { %1167 = vst [vmem:[%s363_s26 + $0x8] sm:$0xff] %v1165_v30  ;;  %v1169_v31 = vpack.c.bf16 %v1165_v30, %v1165_v30  ;;  %v2273_v30 = vld [vmem:[%s3347_s8] ss:$0 sm:$0xff] }
 0x1c4   : > { %1608 = vmatprep.mubr.bf16.mxu0 %v1169_v31  ;;  %1649 = vmatprep.mubr.bf16.mxu1 %v1169_v31 }
 0x1c5   : > { %1609 = vmatmul.mubr.bf16.vlgmr.msra.gmra.mxu0 %v1168_v34  ;;  %1650 = vmatmul.mubr.bf16.vlgmr.msra.gmra.mxu1 %v1168_v34 }
 0x1c6   : > { %2310 = vmatpush3.bf16.msra.mxu0 %v2604_v32  ;;  %2332 = vmatpush3.bf16.msra.mxu1 %v2605_v33 }
 0x1c7   : > { %2311 = vmatprep.subr.bf16.mxu0 %v2606_v35  ;;  %2333 = vmatprep.subr.bf16.mxu1 %v2607_v36 }
 0x1ca   : > { %2312 = vmatpush3.bf16.msra.mxu0 %v2608_v40  ;;  %2334 = vmatpush3.bf16.msra.mxu1 %v2609_v43 }
 0x1cb   : > { %2313 = vmatprep.subr.bf16.mxu0 %v2610_v44  ;;  %2335 = vmatprep.subr.bf16.mxu1 %v2611_v45 }
 0x1ce   : > { %2314 = vmatpush3.bf16.msra.mxu0 %v2612_v46  ;;  %2336 = vmatpush3.bf16.msra.mxu1 %v2613_v47 }
 0x1cf   : > { %2315 = vmatprep.subr.bf16.mxu0 %v2614_v48  ;;  %2337 = vmatprep.subr.bf16.mxu1 %v2615_v49 }
 0x1d2   : > { %2316 = vmatpush3.bf16.msra.mxu0 %v2616_v50  ;;  %2338 = vmatpush3.bf16.msra.mxu1 %v2617_v51 }
 0x1d3   : > { %2317 = vmatprep.subr.bf16.mxu0 %v2618_v52  ;;  %2339 = vmatprep.subr.bf16.mxu1 %v2619_v53 }
 0x1d6   : > { %2318 = vmatpush3.bf16.msra.mxu0 %v2620_v54  ;;  %2340 = vmatpush3.bf16.msra.mxu1 %v2621_v55 }
 0x1d7   : > { %2319 = vmatprep.subr.bf16.mxu0 %v2622_v56  ;;  %2341 = vmatprep.subr.bf16.mxu1 %v2623_v57 }
 0x1da   : > { %2320 = vmatpush3.bf16.msra.mxu0 %v2624_v58  ;;  %2342 = vmatpush3.bf16.msra.mxu1 %v2625_v59 }
 0x1db   : > { %2321 = vmatprep.subr.bf16.mxu0 %v2626_v60  ;;  %2343 = vmatprep.subr.bf16.mxu1 %v2627_v61 }
 0x1de   : > { %2322 = vmatpush3.bf16.msra.mxu0 %v2628_v62  ;;  %2344 = vmatpush3.bf16.msra.mxu1 %v2629_v63 }
 0x1df   : > { %2323 = vmatprep.subr.bf16.mxu0 %v2630_v0  ;;  %2345 = vmatprep.subr.bf16.mxu1 %v2631_v1 }
 0x1e2   : > { %2324 = vmatpush3.bf16.msra.mxu0 %v2632_v2  ;;  %2346 = vmatpush3.bf16.msra.mxu1 %v2633_v3 }
 0x285   : > { %v1610_v7 = vpop.f32.mrf.mxu0  ;;  %v1651_v8 = vpop.f32.mrf.mxu1 }
 0x286   : > { %v1611_v11 = vadd.f32 %v1610_v7, %v1239_v5  ;;  %v1652_v12 = vadd.f32 %v1651_v8, %v1247_v6 }
 0x287   : > { %v1612_v13 = vpop.f32.mrf.mxu0  ;;  %v1653_v14 = vpop.f32.mrf.mxu1 }
 0x288   : > { %v1662_v15 = vmul.f32 0.1, %v1611_v11  ;;  %vm1658_vm6 = vcmp.ge.f32.partialorder %v1611_v11, 0.0  ;;  %v1664_v16 = vmul.f32 0.1, %v1652_v12  ;;  %v1613_v17 = vadd.f32 %v1612_v13, %v1243_v9 }
 0x289   : > { %v1654_v18 = vadd.f32 %v1653_v14, %v1251_v10  ;;  %v1614_v38 = vpop.f32.mrf.mxu0  ;;  %v1655_v19 = vpop.f32.mrf.mxu1  ;;  %vm1660_vm7 = vcmp.ge.f32.partialorder %v1652_v12, 0.0 }
 0x28a   : > { %vm1659_vm8 = vcmp.ge.f32.partialorder %v1613_v17, 0.0  ;;  %v1663_v39 = vmul.f32 0.1, %v1613_v17  ;;  %v1666_v41 = vsel %vm1658_vm6, %v1611_v11, %v1662_v15  ;;  %v1668_v42 = vsel %vm1660_vm7, %v1652_v12, %v1664_v16 }
 0x28b   : > { %v1615_v20 = vpop.f32.mrf.mxu0  ;;  %v1656_v21 = vpop.f32.mrf.mxu1  ;;  %vm1661_vm9 = vcmp.ge.f32.partialorder %v1654_v18, 0.0  ;;  %v1665_v37 = vmul.f32 0.1, %v1654_v18  ;;  %v1670_v25 = vpack.c.bf16 %v1666_v41, %v1666_v41  ;;  %v1672_v27 = vpack.c.bf16 %v1668_v42, %v1668_v42 }
 0x28c   : > { %v1667_v22 = vsel %vm1659_vm8, %v1613_v17, %v1663_v39 }
 0x28d   : > { %v1671_v23 = vpack.c.bf16 %v1667_v22, %v1667_v22  ;;  %v1669_v24 = vsel %vm1661_vm9, %v1654_v18, %v1665_v37 }
 0x28e   : > { %v1673_v26 = vpack.c.bf16 %v1669_v24, %v1669_v24 }
 0x28f   : > { %1969 = vmatprep.mubr.bf16.mxu0 %v1671_v23 }
 0x290   : > { %2009 = vmatprep.mubr.bf16.mxu1 %v1673_v26  ;;  %1970 = vmatmul.mubr.bf16.vlgmr.msra.gmra.mxu0 %v1670_v25 }
 0x291   : > { %2010 = vmatmul.mubr.bf16.vlgmr.msra.gmra.mxu1 %v1672_v27 }
 0x350   : > { %v2325_v28 = vpop.f32.mrf.mxu0 }
 0x351   : > { %v2347_v29 = vpop.f32.mrf.mxu1 }
 0x352   : > { %v2326_v31 = vpop.f32.mrf.mxu0 }
 0x353   : > { %v2327_v32 = vadd.f32 %v2326_v31, %v2325_v28  ;;  %v2348_v33 = vpop.f32.mrf.mxu1 }
 0x354   : > { %v2328_v34 = vpop.f32.mrf.mxu0  ;;  %v2349_v36 = vadd.f32 %v2348_v33, %v2347_v29 }
 0x355   : > { %v1972_v35 = vadd.f32 %v2327_v32, %v2273_v30  ;;  %v2350_v40 = vpop.f32.mrf.mxu1 }
 0x356   : > { %v2329_v43 = vpop.f32.mrf.mxu0 }
 0x357   : > { %v2012_v44 = vadd.f32 %v2349_v36, %v1972_v35  ;;  %v2351_v45 = vpop.f32.mrf.mxu1 }
 0x359   : > { %2017 = vst [vmem:[%s367_s22] sm:$0xff] %v2012_v44 }
 0x35a PF: > { %s21_s13 = sadd.s32 1, %s2640_s13  }
 0x35b   : > { %p18_p4 = scmp.ge.s32.totalorder %s21_s13, 4  }
 0x35d   :  { %20 = sbr.rel (!%p18_p4) target bundleno = 1 (0x1), region = 98 }

</bundles_post_ra>
